<compile_context>
chip_gen: v7x
topology: tpu7x:2x2x1
jax: 0.10.0
libtpu: 0.0.40
codegen_flags: <defaults>
</compile_context>

<pallas_src>
import functools

import jax
import jax.numpy as jnp
from jax import lax
from jax.experimental import pallas as pl
from jax.experimental.pallas import tpu as pltpu


def _round_up(x, m):
    return (x + m - 1) // m * m


def _actor_kernel(obs_ref, w1_ref, b1_ref, w2_ref, b2_ref, wl_ref, bl_ref,
                  *rest, deterministic, with_prob):
    rest = list(rest)
    gumbel_ref = None if deterministic else rest.pop(0)
    act_ref = rest.pop(0)
    probs_ref = rest.pop(0) if with_prob else None

    # --- MLP trunk: Linear -> ReLU -> Linear -> ReLU (output_activation=Identity) ---
    x = obs_ref[...]                                        # bf16 activations
    h = jnp.dot(x, w1_ref[...], preferred_element_type=jnp.float32) + b1_ref[...]
    h = jnp.maximum(h, 0.0).astype(jnp.bfloat16)
    h = jnp.dot(h, w2_ref[...], preferred_element_type=jnp.float32) + b2_ref[...]
    h = jnp.maximum(h, 0.0).astype(jnp.bfloat16)

    # --- logits head (f32) ---
    logits = jnp.dot(h, wl_ref[...], preferred_element_type=jnp.float32) + bl_ref[...]

    act_dim = logits.shape[-1]
    lane_iota = lax.broadcasted_iota(jnp.int32, logits.shape, 1)

    # --- action: argmax(logits) if deterministic, else Gumbel-max sample ---
    score = logits if deterministic else logits + gumbel_ref[...]
    best = jnp.max(score, axis=-1, keepdims=True)
    act = jnp.min(jnp.where(score >= best, lane_iota, act_dim),
                  axis=-1, keepdims=True).astype(jnp.int32)
    # Lane-dense store: broadcast the per-row action across all 128 lanes.
    act_ref[...] = jnp.broadcast_to(act, act_ref.shape)

    # --- softmax probs only when requested ---
    if with_prob:
        m = best if deterministic else jnp.max(logits, axis=-1, keepdims=True)
        e = jnp.exp(logits - m)
        denom = jnp.sum(e, axis=-1, keepdims=True)
        probs_ref[...] = (e * pl.reciprocal(denom, approx=True)).astype(probs_ref.dtype)


def make_params(key, obs_dim, hidden_sizes, act_dim):
    """Deterministic synthetic parameters (PyTorch Linear shapes, stored transposed)."""
    sizes = [obs_dim] + list(hidden_sizes) + [act_dim]
    params = {}
    names = ["w1", "b1", "w2", "b2", "wl", "bl"]
    idx = 0
    for j in range(len(sizes) - 1):
        key, k_w, k_b = jax.random.split(key, 3)
        fan_in = sizes[j]
        scale = 1.0 / jnp.sqrt(jnp.float32(fan_in))
        w = jax.random.uniform(k_w, (sizes[j], sizes[j + 1]),
                               jnp.float32, -scale, scale)
        b = jax.random.uniform(k_b, (1, sizes[j + 1]),
                               jnp.float32, -scale, scale)
        params[names[idx]] = w
        params[names[idx + 1]] = b
        idx += 2
    return params


@functools.partial(jax.jit, static_argnames=("deterministic", "with_prob"))
def discrete_mlp_actor_forward(obs, params, seed,
                               deterministic=False, with_prob=False):
    B, obs_dim = obs.shape
    act_dim = params["wl"].shape[1]

    # Row tiling: pad B to a multiple of 16 (bf16 sublane packing); for large
    # batches tile 256 rows per grid step and let the "parallel" axis split
    # across TensorCores (v7x megacore).
    ROW_BLOCK = 256
    if B <= ROW_BLOCK:
        tb = _round_up(B, 16)
        Bp = tb
    else:
        tb = ROW_BLOCK
        Bp = _round_up(B, tb)
    n_blocks = Bp // tb

    obs_p = obs if Bp == B else jnp.pad(obs, ((0, Bp - B), (0, 0)))
    obs_bf = obs_p.astype(jnp.bfloat16)

    # bf16 weights (halves weight DMA bytes, native MXU input); f32 biases.
    w1 = params["w1"].astype(jnp.bfloat16)
    w2 = params["w2"].astype(jnp.bfloat16)
    wl = params["wl"].astype(jnp.bfloat16)
    b1, b2, bl = params["b1"], params["b2"], params["bl"]

    # NOTE(v7x): at real model sizes, tile K or single-buffer the constant-index
    # weight specs and set vmem_limit_bytes explicitly (64 MiB VMEM on v7x).
    inputs = [obs_bf, w1, b1, w2, b2, wl, bl]
    in_specs = [
        pl.BlockSpec((tb, obs_dim), lambda i: (i, 0)),
        pl.BlockSpec(w1.shape, lambda i: (0, 0)),
        pl.BlockSpec(b1.shape, lambda i: (0, 0)),
        pl.BlockSpec(w2.shape, lambda i: (0, 0)),
        pl.BlockSpec(b2.shape, lambda i: (0, 0)),
        pl.BlockSpec(wl.shape, lambda i: (0, 0)),
        pl.BlockSpec(bl.shape, lambda i: (0, 0)),
    ]
    if not deterministic:
        gumbel = jax.random.gumbel(jax.random.PRNGKey(seed), (Bp, act_dim),
                                   jnp.float32)
        inputs.append(gumbel)
        in_specs.append(pl.BlockSpec((tb, act_dim), lambda i: (i, 0)))

    out_shapes = [jax.ShapeDtypeStruct((Bp, 128), jnp.int32)]
    out_specs = [pl.BlockSpec((tb, 128), lambda i: (i, 0))]
    if with_prob:
        out_shapes.append(jax.ShapeDtypeStruct((Bp, act_dim), jnp.float32))
        out_specs.append(pl.BlockSpec((tb, act_dim), lambda i: (i, 0)))

    kernel = functools.partial(_actor_kernel,
                               deterministic=deterministic,
                               with_prob=with_prob)

    outs = pl.pallas_call(
        kernel,
        grid=(n_blocks,),
        in_specs=in_specs,
        out_specs=out_specs,
        out_shape=out_shapes,
        compiler_params=pltpu.CompilerParams(
            dimension_semantics=("parallel",)),
    )(*inputs)

    actions = outs[0][:B, 0]
    probs = outs[1][:B] if with_prob else None
    return actions, probs


def reference_forward(obs, params):
    """Pure-JAX reference with the same bf16 matmul numerics as the kernel."""
    w1 = params["w1"].astype(jnp.bfloat16)
    w2 = params["w2"].astype(jnp.bfloat16)
    wl = params["wl"].astype(jnp.bfloat16)
    h = jnp.dot(obs.astype(jnp.bfloat16), w1,
                preferred_element_type=jnp.float32) + params["b1"]
    h = jnp.maximum(h, 0.0).astype(jnp.bfloat16)
    h = jnp.dot(h, w2, preferred_element_type=jnp.float32) + params["b2"]
    h = jnp.maximum(h, 0.0).astype(jnp.bfloat16)
    logits = jnp.dot(h, wl, preferred_element_type=jnp.float32) + params["bl"]
    probs = jax.nn.softmax(logits, axis=-1)
    return jnp.argmax(logits, axis=-1).astype(jnp.int32), probs, logits


if __name__ == "__main__":
    key = jax.random.PRNGKey(0)
    B, obs_dim, act_dim = 8, 16, 8
    hidden_sizes = (32, 32)

    k_obs, k_params = jax.random.split(key)
    obs = jax.random.normal(k_obs, (B, obs_dim), jnp.float32)
    params = make_params(k_params, obs_dim, hidden_sizes, act_dim)

    ref_actions_det, ref_probs, ref_logits = reference_forward(obs, params)

    # Stochastic path (default forward: deterministic=False, with_prob=False).
    seed = 123
    actions, probs_none = discrete_mlp_actor_forward(
        obs, params, seed, deterministic=False, with_prob=False)
    jax.block_until_ready(actions)
    assert probs_none is None
    assert actions.shape == (B,)
    assert bool(jnp.all((actions >= 0) & (actions < act_dim)))

    # The sample must equal argmax(logits + gumbel) for the same noise draw.
    Bp = _round_up(B, 16)
    g = jax.random.gumbel(jax.random.PRNGKey(seed), (Bp, act_dim),
                          jnp.float32)[:B]
    ref_samp = jnp.argmax(ref_logits + g, axis=-1).astype(jnp.int32)
    assert bool(jnp.all(actions == ref_samp)), (actions, ref_samp)

    # Deterministic path with probs, checked against the pure-JAX reference.
    actions_det, probs = discrete_mlp_actor_forward(
        obs, params, 0, deterministic=True, with_prob=True)
    jax.block_until_ready((actions_det, probs))
    assert bool(jnp.all(actions_det == ref_actions_det)), (actions_det,
                                                           ref_actions_det)
    # approx (EUP) reciprocal in the softmax -> slightly looser tolerance.
    assert bool(jnp.allclose(probs, ref_probs, atol=5e-3, rtol=5e-3))

    print("KERNEL_OK")
</pallas_src>

<mosaic_0001>
module attributes {stable_mosaic.version = 11 : i64} {
  func.func @_actor_kernel(%arg0: i32, %arg1: memref<16x16xbf16, #tpu.memory_space<vmem>>, %arg2: memref<16x32xbf16, #tpu.memory_space<vmem>>, %arg3: memref<1x32xf32, #tpu.memory_space<vmem>>, %arg4: memref<32x32xbf16, #tpu.memory_space<vmem>>, %arg5: memref<1x32xf32, #tpu.memory_space<vmem>>, %arg6: memref<32x8xbf16, #tpu.memory_space<vmem>>, %arg7: memref<1x8xf32, #tpu.memory_space<vmem>>, %arg8: memref<16x8xf32, #tpu.memory_space<vmem>>, %arg9: memref<16x128xi32, #tpu.memory_space<vmem>>) attributes {dimension_semantics = [#tpu.dimension_semantics<parallel>], iteration_bounds = array<i64: 1>, scalar_prefetch = 0 : i64, scratch_operands = 0 : i64, tpu.core_type = #tpu.core_type<tc>, window_params = [{transform_indices = @transform_0, window_bounds = array<i64: 16, 16>}, {pipeline_mode = #tpu.pipeline_mode<synchronous>, transform_indices = @transform_1, window_bounds = array<i64: 16, 32>}, {pipeline_mode = #tpu.pipeline_mode<synchronous>, transform_indices = @transform_2, window_bounds = array<i64: 1, 32>}, {pipeline_mode = #tpu.pipeline_mode<synchronous>, transform_indices = @transform_3, window_bounds = array<i64: 32, 32>}, {pipeline_mode = #tpu.pipeline_mode<synchronous>, transform_indices = @transform_4, window_bounds = array<i64: 1, 32>}, {pipeline_mode = #tpu.pipeline_mode<synchronous>, transform_indices = @transform_5, window_bounds = array<i64: 32, 8>}, {pipeline_mode = #tpu.pipeline_mode<synchronous>, transform_indices = @transform_6, window_bounds = array<i64: 1, 8>}, {transform_indices = @transform_7, window_bounds = array<i64: 16, 8>}, {transform_indices = @transform_8, window_bounds = array<i64: 16, 128>}]} {
    %c0 = arith.constant 0 : index
    %c0_0 = arith.constant 0 : index
    %0 = vector.load %arg1[%c0, %c0_0] : memref<16x16xbf16, #tpu.memory_space<vmem>>, vector<16x16xbf16>
    %c0_1 = arith.constant 0 : index
    %c0_2 = arith.constant 0 : index
    %1 = vector.load %arg2[%c0_1, %c0_2] : memref<16x32xbf16, #tpu.memory_space<vmem>>, vector<16x32xbf16>
    %cst = arith.constant dense<0.000000e+00> : vector<16x32xf32>
    %2 = tpu.matmul %0, %1, %cst {dimension_numbers = #tpu.dot_dimension_numbers<[1], [0], [0], [1], [0, 0, 1, 1], [], []>} : vector<16x16xbf16>, vector<16x32xbf16>, vector<16x32xf32> -> vector<16x32xf32>
    %c0_3 = arith.constant 0 : index
    %c0_4 = arith.constant 0 : index
    %3 = vector.load %arg3[%c0_3, %c0_4] : memref<1x32xf32, #tpu.memory_space<vmem>>, vector<1x32xf32>
    %4 = vector.broadcast %3 : vector<1x32xf32> to vector<16x32xf32>
    %5 = arith.addf %2, %4 : vector<16x32xf32>
    %cst_5 = arith.constant 0.000000e+00 : f32
    %6 = vector.broadcast %cst_5 : f32 to vector<16x32xf32>
    %7 = arith.maximumf %5, %6 : vector<16x32xf32>
    %8 = arith.truncf %7 : vector<16x32xf32> to vector<16x32xbf16>
    %c0_6 = arith.constant 0 : index
    %c0_7 = arith.constant 0 : index
    %9 = vector.load %arg4[%c0_6, %c0_7] : memref<32x32xbf16, #tpu.memory_space<vmem>>, vector<32x32xbf16>
    %cst_8 = arith.constant dense<0.000000e+00> : vector<16x32xf32>
    %10 = tpu.matmul %8, %9, %cst_8 {dimension_numbers = #tpu.dot_dimension_numbers<[1], [0], [0], [1], [0, 0, 1, 1], [], []>} : vector<16x32xbf16>, vector<32x32xbf16>, vector<16x32xf32> -> vector<16x32xf32>
    %c0_9 = arith.constant 0 : index
    %c0_10 = arith.constant 0 : index
    %11 = vector.load %arg5[%c0_9, %c0_10] : memref<1x32xf32, #tpu.memory_space<vmem>>, vector<1x32xf32>
    %12 = vector.broadcast %11 : vector<1x32xf32> to vector<16x32xf32>
    %13 = arith.addf %10, %12 : vector<16x32xf32>
    %cst_11 = arith.constant 0.000000e+00 : f32
    %14 = vector.broadcast %cst_11 : f32 to vector<16x32xf32>
    %15 = arith.maximumf %13, %14 : vector<16x32xf32>
    %16 = arith.truncf %15 : vector<16x32xf32> to vector<16x32xbf16>
    %c0_12 = arith.constant 0 : index
    %c0_13 = arith.constant 0 : index
    %17 = vector.load %arg6[%c0_12, %c0_13] : memref<32x8xbf16, #tpu.memory_space<vmem>>, vector<32x8xbf16>
    %cst_14 = arith.constant dense<0.000000e+00> : vector<16x8xf32>
    %18 = tpu.matmul %16, %17, %cst_14 {dimension_numbers = #tpu.dot_dimension_numbers<[1], [0], [0], [1], [0, 0, 1, 1], [], []>} : vector<16x32xbf16>, vector<32x8xbf16>, vector<16x8xf32> -> vector<16x8xf32>
    %c0_15 = arith.constant 0 : index
    %c0_16 = arith.constant 0 : index
    %19 = vector.load %arg7[%c0_15, %c0_16] : memref<1x8xf32, #tpu.memory_space<vmem>>, vector<1x8xf32>
    %20 = vector.broadcast %19 : vector<1x8xf32> to vector<16x8xf32>
    %21 = arith.addf %18, %20 : vector<16x8xf32>
    %22 = tpu.iota {dimensions = array<i32: 1>} : vector<16x8xi32>
    %c0_17 = arith.constant 0 : index
    %c0_18 = arith.constant 0 : index
    %23 = vector.load %arg8[%c0_17, %c0_18] : memref<16x8xf32, #tpu.memory_space<vmem>>, vector<16x8xf32>
    %24 = arith.addf %21, %23 : vector<16x8xf32>
    %cst_19 = arith.constant dense<0xFF800000> : vector<16xf32>
    %25 = vector.multi_reduction <maximumf>, %24, %cst_19 [1] : vector<16x8xf32> to vector<16xf32>
    %26 = vector.shape_cast %25 : vector<16xf32> to vector<16x1xf32>
    %27 = vector.broadcast %26 : vector<16x1xf32> to vector<16x8xf32>
    %28 = arith.cmpf oge, %24, %27 : vector<16x8xf32>
    %c8_i32 = arith.constant 8 : i32
    %29 = vector.broadcast %c8_i32 : i32 to vector<16x8xi32>
    %30 = arith.select %28, %22, %29 : vector<16x8xi1>, vector<16x8xi32>
    %cst_20 = arith.constant dense<2147483647> : vector<16xi32>
    %31 = vector.multi_reduction <minsi>, %30, %cst_20 [1] : vector<16x8xi32> to vector<16xi32>
    %32 = vector.shape_cast %31 : vector<16xi32> to vector<16x1xi32>
    %33 = vector.shape_cast %32 : vector<16x1xi32> to vector<16x1xi32>
    %34 = vector.broadcast %33 : vector<16x1xi32> to vector<16x128xi32>
    %c0_21 = arith.constant 0 : index
    %c0_22 = arith.constant 0 : index
    %35 = vector.load %arg9[%c0_21, %c0_22] : memref<16x128xi32, #tpu.memory_space<vmem>>, vector<16x128xi32>
    tpu.vector_store %arg9[%c0_21, %c0_22], %34 {strides = array<i32>} : memref<16x128xi32, #tpu.memory_space<vmem>>, vector<16x128xi32>,
    return
  }
  func.func @transform_0(%arg0: i32) -> (i32, i32) {
    %c0_i32 = arith.constant 0 : i32
    %c0_i32_0 = arith.constant 0 : i32
    return %arg0, %c0_i32 : i32, i32
  }
  func.func @transform_1(%arg0: i32) -> (i32, i32) {
    %c0_i32 = arith.constant 0 : i32
    %c0_i32_0 = arith.constant 0 : i32
    %c0_i32_1 = arith.constant 0 : i32
    return %c0_i32, %c0_i32_0 : i32, i32
  }
  func.func @transform_2(%arg0: i32) -> (i32, i32) {
    %c0_i32 = arith.constant 0 : i32
    %c0_i32_0 = arith.constant 0 : i32
    %c0_i32_1 = arith.constant 0 : i32
    return %c0_i32, %c0_i32_0 : i32, i32
  }
  func.func @transform_3(%arg0: i32) -> (i32, i32) {
    %c0_i32 = arith.constant 0 : i32
    %c0_i32_0 = arith.constant 0 : i32
    %c0_i32_1 = arith.constant 0 : i32
    return %c0_i32, %c0_i32_0 : i32, i32
  }
  func.func @transform_4(%arg0: i32) -> (i32, i32) {
    %c0_i32 = arith.constant 0 : i32
    %c0_i32_0 = arith.constant 0 : i32
    %c0_i32_1 = arith.constant 0 : i32
    return %c0_i32, %c0_i32_0 : i32, i32
  }
  func.func @transform_5(%arg0: i32) -> (i32, i32) {
    %c0_i32 = arith.constant 0 : i32
    %c0_i32_0 = arith.constant 0 : i32
    %c0_i32_1 = arith.constant 0 : i32
    return %c0_i32, %c0_i32_0 : i32, i32
  }
  func.func @transform_6(%arg0: i32) -> (i32, i32) {
    %c0_i32 = arith.constant 0 : i32
    %c0_i32_0 = arith.constant 0 : i32
    %c0_i32_1 = arith.constant 0 : i32
    return %c0_i32, %c0_i32_0 : i32, i32
  }
  func.func @transform_7(%arg0: i32) -> (i32, i32) {
    %c0_i32 = arith.constant 0 : i32
    %c0_i32_0 = arith.constant 0 : i32
    return %arg0, %c0_i32 : i32, i32
  }
  func.func @transform_8(%arg0: i32) -> (i32, i32) {
    %c0_i32 = arith.constant 0 : i32
    %c0_i32_0 = arith.constant 0 : i32
    return %arg0, %c0_i32 : i32, i32
  }
}

</mosaic_0001>

<bundles_post_ra>
// kernel: discrete_mlp_actor_forward.1
= control target key start
LH: loop header
LB: loop body
LE: loop exit
PB: predicated region body
PF: predicated region fallthrough
CT: control target
= control target key end

     0   :  { %v341_v0 = vmov 0.0   ;;  %vm342_vm0 = vmmov 0   ;;  %vm52_vm1 = vcmask 130048   ;;  %vm123_vm2 = vcmask 261120   ;;  %s433_s1 = inlined_call_operand.vmem [shape: bf16[16,32], index: 1, kind: input, shape index: {}]   ;;  %s434_s0 = inlined_call_operand.vmem [shape: bf16[16,16], index: 0, kind: input, shape index: {}]   ;;  %s435_s3 = inlined_call_operand.vmem [shape: bf16[32,32], index: 3, kind: input, shape index: {}]   ;;  %s436_s2 = inlined_call_operand.vmem [shape: f32[1,32], index: 2, kind: input, shape index: {}]   ;;  %s437_s5 = inlined_call_operand.vmem [shape: bf16[32,8], index: 5, kind: input, shape index: {}]   ;;  %s438_s4 = inlined_call_operand.vmem [shape: f32[1,32], index: 4, kind: input, shape index: {}]   ;;  %s439_s6 = inlined_call_operand.vmem [shape: f32[1,8], index: 6, kind: input, shape index: {}]   ;;  %s440_s7 = inlined_call_operand.vmem [shape: f32[16,8], index: 7, kind: input, shape index: {}]   ;;  %s441_s8 = inlined_call_operand.vmem [shape: s32[16,128], index: 8, kind: output, shape index: {}]  }
   0x1   :  { %311 = vmatprep.subr.bf16.mxu0 %v341_v0  ;;  %v335_v1 = vld [vmem:[%s433_s1] sm:$0xff]   ;;  %313 = vmatprep.mubr.msk.bf16.mxu0 %vm342_vm0, %v341_v0  ;;  %v338_v4 = vld [vmem:[%s435_s3 + $0x8] sm:$0xff]   ;;  %vm244_vm3 = vcmask 64512   ;;  %v238_v40 = vlaneseq }
   0x2   :  { %v336_v2 = vld [vmem:[%s434_s0] sm:$0xff]   ;;  %317 = vmatprep.subr.bf16.mxu1 %v341_v0  ;;  %321 = vmatprep.mubr.msk.bf16.mxu1 %vm342_vm0, %v341_v0  ;;  %v340_v16 = vld [vmem:[%s437_s5 + $0x8] sm:$0xff]  }
   0x3   :  { %312 = vmatpush3.bf16.msra.mxu0 %v335_v1  ;;  %v337_v3 = vld [vmem:[%s435_s3] sm:$0xff]   ;;  %v241_v33 = vld [vmem:[%s440_s7 + $0x8] sm:$0xff]  ;;  %v239_v41 = vand.u32 127, %v238_v40 }
   0x4   :  { %325 = vmatprep.subr.bf16.mxu0 %v341_v0  ;;  %318 = vmatpush3.bf16.msra.mxu1 %v337_v3  ;;  %v291_v5 = vld [vmem:[%s436_s2] ss:$0 sm:$0xff] }
   0x5   :  { %319 = vmatprep.subr.bf16.mxu1 %v341_v0  ;;  %v339_v15 = vld [vmem:[%s437_s5] sm:$0xff]  }
   0x6   :  { %314 = vmatmul.mubr.msk.bf16.vlgmr.msra.gmra.mrb[0].mxu0 %vm52_vm1, %v336_v2  ;;  %v295_v17 = vld [vmem:[%s438_s4] ss:$0 sm:$0xff] }
   0x7   :  { %329 = vmatprep.mubr.msk.bf16.mxu0 %vm342_vm0, %v341_v0  ;;  %326 = vmatpush3.bf16.msra.mxu0 %v339_v15  ;;  %v299_v27 = vld [vmem:[%s439_s6] ss:$0 sm:$0xff] }
   0x8   :  { %320 = vmatpush3.bf16.msra.mxu1 %v338_v4  ;;  %327 = vmatprep.subr.bf16.mxu0 %v341_v0  ;;  %v240_v29 = vld [vmem:[%s440_s7] sm:$0xff] }
   0xb   :  { %328 = vmatpush3.bf16.msra.mxu0 %v340_v16 }
  0xd9   :  { %v90_v6 = vpop.f32.mrb[0].mxu0 }
  0xda   :  { %v91_v7 = vadd.f32 %v291_v5, %v90_v6  ;;  %v315_v8 = vpop.f32.mrb[1].mxu0 }
  0xdb   :  { %v93_v9 = vpop.f32.mrb[2].mxu0 }
  0xdc   :  { %v94_v10 = vadd.f32 %v291_v5, %v93_v9  ;;  %v316_v11 = vpop.f32.mrb[3].mxu0  ;;  %v97_v12 = vmax.f32 %v91_v7, 0.0 }
  0xde   :  { %v98_v13 = vmax.f32 %v94_v10, 0.0 }
  0xe0   :  { %v99_v14 = vpack.c.bf16 %v98_v13, %v97_v12 }
  0xe2   :  { %322 = vmatmul.mubr.msk.bf16.vlgmr.msra.gmra.mrb[0].mxu1 %vm123_vm2, %v99_v14 }
 0x1b5   :  { %v161_v18 = vpop.f32.mrb[0].mxu1 }
 0x1b6   :  { %v162_v19 = vadd.f32 %v295_v17, %v161_v18  ;;  %v323_v20 = vpop.f32.mrb[1].mxu1 }
 0x1b7   :  { %v164_v21 = vpop.f32.mrb[2].mxu1 }
 0x1b8   :  { %v165_v22 = vadd.f32 %v295_v17, %v164_v21  ;;  %v324_v23 = vpop.f32.mrb[3].mxu1  ;;  %v168_v24 = vmax.f32 %v162_v19, 0.0 }
 0x1ba   :  { %v169_v25 = vmax.f32 %v165_v22, 0.0 }
 0x1bc   :  { %v170_v26 = vpack.c.bf16 %v169_v25, %v168_v24 }
 0x1be   :  { %330 = vmatmul.mubr.msk.bf16.vlgmr.msra.gmra.mrb[4].mxu0 %vm123_vm2, %v170_v26 }
 0x291   :  { %v231_v28 = vpop.f32.mrb[4].mxu0 }
 0x292   :  { %v232_v30 = vadd.f32 %v299_v27, %v231_v28  ;;  %v331_v31 = vpop.f32.mrb[5].mxu0 }
 0x293   :  { %v234_v32 = vpop.f32.mrb[6].mxu0 }
 0x294   :  { %v235_v34 = vadd.f32 %v299_v27, %v234_v32  ;;  %v332_v35 = vpop.f32.mrb[7].mxu0  ;;  %v242_v36 = vadd.f32 %v240_v29, %v232_v30 }
 0x296   :  { %v245_v37 = vsel %vm244_vm3, %v242_v36, -inf  ;;  %v243_v38 = vadd.f32 %v241_v33, %v235_v34 }
 0x297   :  { %246 = vmax.xlane.f32.xlu0 %v245_v37 }
 0x298   :  { %v248_v39 = vsel %vm244_vm3, %v243_v38, -inf }
 0x29b   :  { %249 = vmax.xlane.f32.xlu0 %v248_v39 }
 0x324   :  { %v247_v42 = vpop.xlane.xlu0 %246 }
 0x325   :  { %vm251_vm4 = vcmp.ge.f32.partialorder %v242_v36, %v247_v42 }
 0x326   :  { %v253_v43 = vsel %vm251_vm4, %v239_v41, 8 }
 0x327   :  { %v255_v44 = vsel %vm244_vm3, %v253_v43, 2147483647 }
 0x328   :  { %v250_v45 = vpop.xlane.xlu0 %249  ;;  %v257_v46 = vshra.s32 %v255_v44, 16  ;;  %v256_v52 = vand.u32 65535, %v255_v44 }
 0x329   :  { %vm252_vm5 = vcmp.ge.f32.partialorder %v243_v38, %v250_v45 }
 0x32a   :  { %v254_v47 = vsel %vm252_vm5, %v239_v41, 8  ;;  %v259_v48 = vcvt.s32.f32 %v257_v46  ;;  %v258_v54 = vcvt.s32.f32 %v256_v52 }
 0x32b   :  { %v270_v49 = vsel %vm244_vm3, %v254_v47, 2147483647 }
 0x32c   :  { %260 = vmin.xlane.f32.xlu1 %v259_v48  ;;  %v272_v50 = vshra.s32 %v270_v49, 16  ;;  %v271_v55 = vand.u32 65535, %v270_v49 }
 0x32e   :  { %v274_v51 = vcvt.s32.f32 %v272_v50  ;;  %v273_v58 = vcvt.s32.f32 %v271_v55 }
 0x330   :  { %275 = vmin.xlane.f32.xlu1 %v274_v51 }
 0x3b9   :  { %v261_v53 = vpop.xlane.xlu1 %260 }
 0x3ba   :  { %vm262_vm6 = vcmp.eq.f32.partialorder %v259_v48, %v261_v53  ;;  %v267_v60 = vcvt.f32.s32 %v261_v53 }
 0x3bb   :  { %v263_v56 = vsel %vm262_vm6, %v258_v54, inf }
 0x3bc   :  { %264 = vmin.xlane.f32.xlu0 %v263_v56  ;;  %v268_v62 = vshll.u32 %v267_v60, 16 }
 0x3bd   :  { %v276_v57 = vpop.xlane.xlu1 %275 }
 0x3be   :  { %vm277_vm7 = vcmp.eq.f32.partialorder %v274_v51, %v276_v57  ;;  %v282_v63 = vcvt.f32.s32 %v276_v57 }
 0x3bf   :  { %v278_v59 = vsel %vm277_vm7, %v273_v58, inf }
 0x3c0   :  { %279 = vmin.xlane.f32.xlu1 %v278_v59  ;;  %v283_v3 = vshll.u32 %v282_v63, 16 }
 0x449   :  { %v265_v61 = vpop.xlane.xlu0 %264 }
 0x44a   :  { %v266_v0 = vcvt.f32.s32 %v265_v61 }
 0x44c   :  { %v269_v1 = vadd.s32 %v268_v62, %v266_v0 }
 0x44d   :  { %v280_v2 = vpop.xlane.xlu1 %279 }
 0x44e   :  { %285 = vst [vmem:[%s441_s8] sm:$0xff] %v269_v1  ;;  %v281_v4 = vcvt.f32.s32 %v280_v2 }
 0x450   :  { %v284_v5 = vadd.s32 %v283_v3, %v281_v4 }
 0x452   :  { %286 = vst [vmem:[%s441_s8 + $0x8] sm:$0xff] %v284_v5 }

</bundles_post_ra>
